<compile_context>
chip_gen: v5e
topology: v5e:2x2
jax: 0.10.0
libtpu: 0.0.40
codegen_flags: <defaults>
</compile_context>

<pallas_src>
import functools

import jax
import jax.numpy as jnp
from jax.experimental import pallas as pl
from jax.experimental.pallas import tpu as pltpu

EPS = 1e-6  # CosineSimilarity eps (module default)


def _rbf_params():
    """Replicates KernelInteractionModel.__init__ kernel list (K = 11)."""
    mus = [1.0]
    sig2 = [0.001 ** 2]
    for i in range(-9, 10, 2):
        mus.append(i / 10.0)
        sig2.append(0.1 ** 2)
    inv_two_sigma_sqr = [1.0 / (2.0 * s) for s in sig2]
    return mus, inv_two_sigma_sqr


def _round_up(x, m):
    return ((x + m - 1) // m) * m


def _tpu_budgets():
    """Per-generation block / VMEM budgets."""
    try:
        kind = jax.devices()[0].device_kind.lower()
    except Exception:  # pragma: no cover - defensive
        kind = ""
    if "v7" in kind:
        # 64 MiB VMEM per TC, 2 TCs/chip -> smaller blocks, more batch steps.
        return dict(target_bytes=2 << 20, vmem_limit=32 << 20, min_steps=4)
    # v5e / v6e: 128 MiB physical VMEM -> bigger blocks amortize step overhead.
    return dict(target_bytes=4 << 20, vmem_limit=64 << 20, min_steps=2)


def _choose_blocks(B, L, D, itemsize, *, target_bytes, min_steps):
    """Pick (tb, tl) so one *padded* input block stays ~target_bytes.

    Constraints honoured:
      * out block (tb, 2K): second-minor dim tb must be a multiple of 8 or == B.
      * in block (tb, tl, D): tl must be a multiple of the sublane pack or == L;
        D (minor, reduce axis of the cosine) always stays whole.
      * VMEM accounting uses lane-padded sizes (minor dim padded to 128).
    """
    sub = 8 * max(1, 4 // max(1, itemsize))        # 8 (f32) / 16 (bf16) / 32 (i8)
    d_pad = _round_up(D, 128)
    row_bytes = _round_up(L, sub) * d_pad * itemsize   # one padded batch row

    rows = max(1, target_bytes // max(1, row_bytes))
    tb = B if rows >= B else max(8, (rows // 8) * 8)
    # Leave several batch grid steps for megacore sharding / DMA pipelining.
    if B > 8:
        tb = min(tb, max(8, (pl.cdiv(B, min_steps) // 8) * 8))
    tb = min(tb, B)
    if tb < B:
        tb = max(8, (tb // 8) * 8)

    # L tiling (reduction axis, innermost grid axis) when a tb-row slab is still
    # too big.  tl must divide L (padded garbage would otherwise leak into the
    # pooled sums) and be a multiple of `sub`; otherwise fall back to full L.
    # TODO(synk): mask partial L tiles in-kernel to lift the divisibility rule.
    tl = L
    if tb * row_bytes > target_bytes and L % sub == 0:
        max_tl = max(sub, (target_bytes // (tb * d_pad * itemsize)) // sub * sub)
        cand = min(max_tl, (L // sub) * sub)
        while cand >= sub:
            if L % cand == 0:
                tl = cand
                break
            cand -= sub
    return tb, tl


def _make_kim_kernel(mus, inv2s, *, transpose, out_dtype):
    """Build the kernel body with the RBF constants baked in as scalars."""
    K = len(mus)
    eps2 = EPS * EPS

    def kernel(ve_ref, e_ref, w_ref, out_ref, acc_ref):
        li = pl.program_id(1)
        nl = pl.num_programs(1)

        ve = ve_ref[...]
        E = e_ref[...]
        W = w_ref[...]
        if transpose:
            # (tb, tl, D) -> (tb, D, tl): in-VMEM relayout on the XLU slot; keeps
            # the D-reduction multiplies and all pooling work lane-dense over L
            # without any extra HBM traffic.
            ve = jnp.swapaxes(ve, 1, 2)
            E = jnp.swapaxes(E, 1, 2)
            W = jnp.swapaxes(W, 1, 2)
            red = 1
        else:
            red = 2

        # Embedding-axis reductions with f32 accumulation (no whole-tile upcast);
        # ve self-norm computed once and shared by both cosines.
        sv = jnp.sum(ve * ve, axis=red, dtype=jnp.float32)   # (tb, tl)
        se = jnp.sum(E * E, axis=red, dtype=jnp.float32)
        sw = jnp.sum(W * W, axis=red, dtype=jnp.float32)
        de = jnp.sum(ve * E, axis=red, dtype=jnp.float32)
        dw = jnp.sum(ve * W, axis=red, dtype=jnp.float32)

        # torch.nn.CosineSimilarity: dot / sqrt(clamp(|a|^2 * |b|^2, eps^2)).
        cos_e = de * jax.lax.rsqrt(jnp.maximum(sv * se, eps2))
        cos_w = dw * jax.lax.rsqrt(jnp.maximum(sv * sw, eps2))

        # Unrolled RBF pooling on the lane-dense (tb, tl) cosine tiles; the 22
        # partial sums are concatenated and written with a single store.
        cols = []
        for cos in (cos_e, cos_w):                 # [Phi_e | Phi_w] column order
            for k in range(K):
                d = cos - mus[k]
                cols.append(jnp.sum(jnp.exp(-(d * d) * inv2s[k]),
                                    axis=1, keepdims=True))
        phi = jnp.concatenate(cols, axis=1)        # (tb, 2K) f32

        @pl.when(li == 0)
        def _init():
            acc_ref[...] = jnp.zeros_like(acc_ref)

        acc_ref[...] += phi

        @pl.when(li == nl - 1)
        def _finalize():
            out_ref[...] = acc_ref[...].astype(out_dtype)

    return kernel


@functools.partial(jax.jit, static_argnames=("block_b", "block_l"))
def kernel_interaction_model(ve, E, W, *, block_b=None, block_l=None):
    """Pallas-backed forward pass.  ve, E, W: (B, L, D) -> Phi: (B, 2K)."""
    assert ve.shape == E.shape == W.shape, (ve.shape, E.shape, W.shape)
    B, L, D = ve.shape
    mus, inv2s = _rbf_params()
    K = len(mus)
    out_dtype = ve.dtype

    budgets = _tpu_budgets()
    itemsize = jnp.dtype(ve.dtype).itemsize
    tb, tl = _choose_blocks(B, L, D, itemsize,
                            target_bytes=budgets["target_bytes"],
                            min_steps=budgets["min_steps"])
    if block_b is not None:
        tb = block_b
    if block_l is not None:
        tl = block_l
    assert tb == B or tb % 8 == 0, tb                 # out block (tb, 2K) rule
    assert tl == L or (L % tl == 0 and tl % 8 == 0), (tl, L)

    # Lane-dense layout: narrow embedding + wide L tile -> transpose inside the
    # kernel (never in HBM).
    transpose = (D < 128) and (tl >= 128)

    grid = (pl.cdiv(B, tb), pl.cdiv(L, tl))
    in_spec = pl.BlockSpec((tb, tl, D), lambda i, l: (i, l, 0))
    out_spec = pl.BlockSpec((tb, 2 * K), lambda i, l: (i, 0))

    kernel = _make_kim_kernel(mus, inv2s, transpose=transpose,
                              out_dtype=out_dtype)

    return pl.pallas_call(
        kernel,
        out_shape=jax.ShapeDtypeStruct((B, 2 * K), out_dtype),
        grid=grid,
        in_specs=[in_spec, in_spec, in_spec],
        out_specs=out_spec,
        scratch_shapes=[pltpu.VMEM((tb, 2 * K), jnp.float32)],
        compiler_params=pltpu.CompilerParams(
            dimension_semantics=("parallel", "arbitrary"),
            vmem_limit_bytes=budgets["vmem_limit"],
        ),
    )(ve, E, W)


def _reference(ve, E, W):
    """Pure-JAX reference matching the PyTorch forward (incl. eps handling)."""
    mus, inv2s = _rbf_params()
    mus_a = jnp.asarray(mus, jnp.float32)
    inv_a = jnp.asarray(inv2s, jnp.float32)
    a = ve.astype(jnp.float32)
    b = E.astype(jnp.float32)
    c = W.astype(jnp.float32)

    def cossim(x, y):
        dot = jnp.sum(x * y, axis=2)
        nn2 = jnp.sum(x * x, axis=2) * jnp.sum(y * y, axis=2)
        return dot / jnp.sqrt(jnp.maximum(nn2, EPS * EPS))

    def pool(cos):
        diff = cos[:, :, None] - mus_a[None, None, :]
        return jnp.sum(jnp.exp(-(diff * diff) * inv_a[None, None, :]), axis=1)

    return jnp.concatenate([pool(cossim(a, b)), pool(cossim(a, c))], axis=1)


if __name__ == "__main__":
    key = jax.random.PRNGKey(0)

    def run_case(B, L, D, atol=1e-3, rtol=1e-3, **kw):
        k1, k2, k3 = jax.random.split(
            jax.random.fold_in(key, B * 1000003 + L * 1009 + D), 3)
        ve = jax.random.normal(k1, (B, L, D), jnp.float32)
        E = jax.random.normal(k2, (B, L, D), jnp.float32)
        W = jax.random.normal(k3, (B, L, D), jnp.float32)
        out = kernel_interaction_model(ve, E, W, **kw)
        jax.block_until_ready(out)
        ref = _reference(ve, E, W)
        assert out.shape == (B, 22), (out.shape, (B, 22))
        assert jnp.allclose(out, ref, atol=atol, rtol=rtol), (
            (B, L, D), float(jnp.max(jnp.abs(out - ref))))

    # Primary small case (module's natural small shapes).
    run_case(2, 8, 32)
    # Narrow-D / long-L: in-kernel lane-dense transpose + multi-step batch axis.
    run_case(16, 256, 32)
    # Same shapes, forced L tiling: exercises the accumulator / pl.when path
    # together with the transposed layout.
    run_case(16, 256, 32, block_b=8, block_l=128)
    # Odd sizes: partial batch block + L tiling on the non-transposed path.
    run_case(10, 96, 40, block_b=8, block_l=48)
    # Wide embedding (D >= 128): non-transposed lane-reduce path.
    run_case(4, 64, 256)

    print("KERNEL_OK")
</pallas_src>

<mosaic_0001>
module attributes {stable_mosaic.version = 11 : i64} {
  func.func @kernel(%arg0: i32, %arg1: i32, %arg2: memref<2x8x32xf32, #tpu.memory_space<vmem>>, %arg3: memref<2x8x32xf32, #tpu.memory_space<vmem>>, %arg4: memref<2x8x32xf32, #tpu.memory_space<vmem>>, %arg5: memref<2x22xf32, #tpu.memory_space<vmem>>, %arg6: memref<2x22xf32, #tpu.memory_space<vmem>>) attributes {dimension_semantics = [#tpu.dimension_semantics<parallel>, #tpu.dimension_semantics<arbitrary>], iteration_bounds = array<i64: 1, 1>, scalar_prefetch = 0 : i64, scratch_operands = 1 : i64, tpu.core_type = #tpu.core_type<tc>, window_params = [{transform_indices = @transform_0, window_bounds = array<i64: 2, 8, 32>}, {transform_indices = @transform_1, window_bounds = array<i64: 2, 8, 32>}, {transform_indices = @transform_2, window_bounds = array<i64: 2, 8, 32>}, {transform_indices = @transform_3, window_bounds = array<i64: 2, 22>}]} {
    %c0 = arith.constant 0 : index
    %c0_0 = arith.constant 0 : index
    %c0_1 = arith.constant 0 : index
    %0 = vector.load %arg2[%c0, %c0_0, %c0_1] : memref<2x8x32xf32, #tpu.memory_space<vmem>>, vector<2x8x32xf32>
    %c0_2 = arith.constant 0 : index
    %c0_3 = arith.constant 0 : index
    %c0_4 = arith.constant 0 : index
    %1 = vector.load %arg3[%c0_2, %c0_3, %c0_4] : memref<2x8x32xf32, #tpu.memory_space<vmem>>, vector<2x8x32xf32>
    %c0_5 = arith.constant 0 : index
    %c0_6 = arith.constant 0 : index
    %c0_7 = arith.constant 0 : index
    %2 = vector.load %arg4[%c0_5, %c0_6, %c0_7] : memref<2x8x32xf32, #tpu.memory_space<vmem>>, vector<2x8x32xf32>
    %3 = arith.mulf %0, %0 : vector<2x8x32xf32>
    %cst = arith.constant dense<0.000000e+00> : vector<2x8xf32>
    %4 = vector.multi_reduction <add>, %3, %cst [2] : vector<2x8x32xf32> to vector<2x8xf32>
    %5 = arith.mulf %1, %1 : vector<2x8x32xf32>
    %cst_8 = arith.constant dense<0.000000e+00> : vector<2x8xf32>
    %6 = vector.multi_reduction <add>, %5, %cst_8 [2] : vector<2x8x32xf32> to vector<2x8xf32>
    %7 = arith.mulf %2, %2 : vector<2x8x32xf32>
    %cst_9 = arith.constant dense<0.000000e+00> : vector<2x8xf32>
    %8 = vector.multi_reduction <add>, %7, %cst_9 [2] : vector<2x8x32xf32> to vector<2x8xf32>
    %9 = arith.mulf %0, %1 : vector<2x8x32xf32>
    %cst_10 = arith.constant dense<0.000000e+00> : vector<2x8xf32>
    %10 = vector.multi_reduction <add>, %9, %cst_10 [2] : vector<2x8x32xf32> to vector<2x8xf32>
    %11 = arith.mulf %0, %2 : vector<2x8x32xf32>
    %cst_11 = arith.constant dense<0.000000e+00> : vector<2x8xf32>
    %12 = vector.multi_reduction <add>, %11, %cst_11 [2] : vector<2x8x32xf32> to vector<2x8xf32>
    %13 = arith.mulf %4, %6 : vector<2x8xf32>
    %cst_12 = arith.constant 9.99999996E-13 : f32
    %14 = vector.broadcast %cst_12 : f32 to vector<2x8xf32>
    %15 = arith.maximumf %13, %14 : vector<2x8xf32>
    %16 = math.rsqrt %15 : vector<2x8xf32>
    %17 = arith.mulf %10, %16 : vector<2x8xf32>
    %18 = arith.mulf %4, %8 : vector<2x8xf32>
    %cst_13 = arith.constant 9.99999996E-13 : f32
    %19 = vector.broadcast %cst_13 : f32 to vector<2x8xf32>
    %20 = arith.maximumf %18, %19 : vector<2x8xf32>
    %21 = math.rsqrt %20 : vector<2x8xf32>
    %22 = arith.mulf %12, %21 : vector<2x8xf32>
    %cst_14 = arith.constant 1.000000e+00 : f32
    %23 = vector.broadcast %cst_14 : f32 to vector<2x8xf32>
    %24 = arith.subf %17, %23 : vector<2x8xf32>
    %25 = arith.mulf %24, %24 : vector<2x8xf32>
    %cst_15 = arith.constant 0.000000e+00 : f32
    %26 = vector.broadcast %cst_15 : f32 to vector<2x8xf32>
    %27 = arith.subf %26, %25 : vector<2x8xf32>
    %cst_16 = arith.constant 5.000000e+05 : f32
    %28 = vector.broadcast %cst_16 : f32 to vector<2x8xf32>
    %29 = arith.mulf %27, %28 : vector<2x8xf32>
    %30 = math.exp %29 : vector<2x8xf32>
    %cst_17 = arith.constant dense<0.000000e+00> : vector<2xf32>
    %31 = vector.multi_reduction <add>, %30, %cst_17 [1] : vector<2x8xf32> to vector<2xf32>
    %32 = vector.shape_cast %31 : vector<2xf32> to vector<2x1xf32>
    %cst_18 = arith.constant -0.899999976 : f32
    %33 = vector.broadcast %cst_18 : f32 to vector<2x8xf32>
    %34 = arith.subf %17, %33 : vector<2x8xf32>
    %35 = arith.mulf %34, %34 : vector<2x8xf32>
    %cst_19 = arith.constant 0.000000e+00 : f32
    %36 = vector.broadcast %cst_19 : f32 to vector<2x8xf32>
    %37 = arith.subf %36, %35 : vector<2x8xf32>
    %cst_20 = arith.constant 5.000000e+01 : f32
    %38 = vector.broadcast %cst_20 : f32 to vector<2x8xf32>
    %39 = arith.mulf %37, %38 : vector<2x8xf32>
    %40 = math.exp %39 : vector<2x8xf32>
    %cst_21 = arith.constant dense<0.000000e+00> : vector<2xf32>
    %41 = vector.multi_reduction <add>, %40, %cst_21 [1] : vector<2x8xf32> to vector<2xf32>
    %42 = vector.shape_cast %41 : vector<2xf32> to vector<2x1xf32>
    %cst_22 = arith.constant -0.699999988 : f32
    %43 = vector.broadcast %cst_22 : f32 to vector<2x8xf32>
    %44 = arith.subf %17, %43 : vector<2x8xf32>
    %45 = arith.mulf %44, %44 : vector<2x8xf32>
    %cst_23 = arith.constant 0.000000e+00 : f32
    %46 = vector.broadcast %cst_23 : f32 to vector<2x8xf32>
    %47 = arith.subf %46, %45 : vector<2x8xf32>
    %cst_24 = arith.constant 5.000000e+01 : f32
    %48 = vector.broadcast %cst_24 : f32 to vector<2x8xf32>
    %49 = arith.mulf %47, %48 : vector<2x8xf32>
    %50 = math.exp %49 : vector<2x8xf32>
    %cst_25 = arith.constant dense<0.000000e+00> : vector<2xf32>
    %51 = vector.multi_reduction <add>, %50, %cst_25 [1] : vector<2x8xf32> to vector<2xf32>
    %52 = vector.shape_cast %51 : vector<2xf32> to vector<2x1xf32>
    %cst_26 = arith.constant -5.000000e-01 : f32
    %53 = vector.broadcast %cst_26 : f32 to vector<2x8xf32>
    %54 = arith.subf %17, %53 : vector<2x8xf32>
    %55 = arith.mulf %54, %54 : vector<2x8xf32>
    %cst_27 = arith.constant 0.000000e+00 : f32
    %56 = vector.broadcast %cst_27 : f32 to vector<2x8xf32>
    %57 = arith.subf %56, %55 : vector<2x8xf32>
    %cst_28 = arith.constant 5.000000e+01 : f32
    %58 = vector.broadcast %cst_28 : f32 to vector<2x8xf32>
    %59 = arith.mulf %57, %58 : vector<2x8xf32>
    %60 = math.exp %59 : vector<2x8xf32>
    %cst_29 = arith.constant dense<0.000000e+00> : vector<2xf32>
    %61 = vector.multi_reduction <add>, %60, %cst_29 [1] : vector<2x8xf32> to vector<2xf32>
    %62 = vector.shape_cast %61 : vector<2xf32> to vector<2x1xf32>
    %cst_30 = arith.constant -3.000000e-01 : f32
    %63 = vector.broadcast %cst_30 : f32 to vector<2x8xf32>
    %64 = arith.subf %17, %63 : vector<2x8xf32>
    %65 = arith.mulf %64, %64 : vector<2x8xf32>
    %cst_31 = arith.constant 0.000000e+00 : f32
    %66 = vector.broadcast %cst_31 : f32 to vector<2x8xf32>
    %67 = arith.subf %66, %65 : vector<2x8xf32>
    %cst_32 = arith.constant 5.000000e+01 : f32
    %68 = vector.broadcast %cst_32 : f32 to vector<2x8xf32>
    %69 = arith.mulf %67, %68 : vector<2x8xf32>
    %70 = math.exp %69 : vector<2x8xf32>
    %cst_33 = arith.constant dense<0.000000e+00> : vector<2xf32>
    %71 = vector.multi_reduction <add>, %70, %cst_33 [1] : vector<2x8xf32> to vector<2xf32>
    %72 = vector.shape_cast %71 : vector<2xf32> to vector<2x1xf32>
    %cst_34 = arith.constant -1.000000e-01 : f32
    %73 = vector.broadcast %cst_34 : f32 to vector<2x8xf32>
    %74 = arith.subf %17, %73 : vector<2x8xf32>
    %75 = arith.mulf %74, %74 : vector<2x8xf32>
    %cst_35 = arith.constant 0.000000e+00 : f32
    %76 = vector.broadcast %cst_35 : f32 to vector<2x8xf32>
    %77 = arith.subf %76, %75 : vector<2x8xf32>
    %cst_36 = arith.constant 5.000000e+01 : f32
    %78 = vector.broadcast %cst_36 : f32 to vector<2x8xf32>
    %79 = arith.mulf %77, %78 : vector<2x8xf32>
    %80 = math.exp %79 : vector<2x8xf32>
    %cst_37 = arith.constant dense<0.000000e+00> : vector<2xf32>
    %81 = vector.multi_reduction <add>, %80, %cst_37 [1] : vector<2x8xf32> to vector<2xf32>
    %82 = vector.shape_cast %81 : vector<2xf32> to vector<2x1xf32>
    %cst_38 = arith.constant 1.000000e-01 : f32
    %83 = vector.broadcast %cst_38 : f32 to vector<2x8xf32>
    %84 = arith.subf %17, %83 : vector<2x8xf32>
    %85 = arith.mulf %84, %84 : vector<2x8xf32>
    %cst_39 = arith.constant 0.000000e+00 : f32
    %86 = vector.broadcast %cst_39 : f32 to vector<2x8xf32>
    %87 = arith.subf %86, %85 : vector<2x8xf32>
    %cst_40 = arith.constant 5.000000e+01 : f32
    %88 = vector.broadcast %cst_40 : f32 to vector<2x8xf32>
    %89 = arith.mulf %87, %88 : vector<2x8xf32>
    %90 = math.exp %89 : vector<2x8xf32>
    %cst_41 = arith.constant dense<0.000000e+00> : vector<2xf32>
    %91 = vector.multi_reduction <add>, %90, %cst_41 [1] : vector<2x8xf32> to vector<2xf32>
    %92 = vector.shape_cast %91 : vector<2xf32> to vector<2x1xf32>
    %cst_42 = arith.constant 3.000000e-01 : f32
    %93 = vector.broadcast %cst_42 : f32 to vector<2x8xf32>
    %94 = arith.subf %17, %93 : vector<2x8xf32>
    %95 = arith.mulf %94, %94 : vector<2x8xf32>
    %cst_43 = arith.constant 0.000000e+00 : f32
    %96 = vector.broadcast %cst_43 : f32 to vector<2x8xf32>
    %97 = arith.subf %96, %95 : vector<2x8xf32>
    %cst_44 = arith.constant 5.000000e+01 : f32
    %98 = vector.broadcast %cst_44 : f32 to vector<2x8xf32>
    %99 = arith.mulf %97, %98 : vector<2x8xf32>
    %100 = math.exp %99 : vector<2x8xf32>
    %cst_45 = arith.constant dense<0.000000e+00> : vector<2xf32>
    %101 = vector.multi_reduction <add>, %100, %cst_45 [1] : vector<2x8xf32> to vector<2xf32>
    %102 = vector.shape_cast %101 : vector<2xf32> to vector<2x1xf32>
    %cst_46 = arith.constant 5.000000e-01 : f32
    %103 = vector.broadcast %cst_46 : f32 to vector<2x8xf32>
    %104 = arith.subf %17, %103 : vector<2x8xf32>
    %105 = arith.mulf %104, %104 : vector<2x8xf32>
    %cst_47 = arith.constant 0.000000e+00 : f32
    %106 = vector.broadcast %cst_47 : f32 to vector<2x8xf32>
    %107 = arith.subf %106, %105 : vector<2x8xf32>
    %cst_48 = arith.constant 5.000000e+01 : f32
    %108 = vector.broadcast %cst_48 : f32 to vector<2x8xf32>
    %109 = arith.mulf %107, %108 : vector<2x8xf32>
    %110 = math.exp %109 : vector<2x8xf32>
    %cst_49 = arith.constant dense<0.000000e+00> : vector<2xf32>
    %111 = vector.multi_reduction <add>, %110, %cst_49 [1] : vector<2x8xf32> to vector<2xf32>
    %112 = vector.shape_cast %111 : vector<2xf32> to vector<2x1xf32>
    %cst_50 = arith.constant 0.699999988 : f32
    %113 = vector.broadcast %cst_50 : f32 to vector<2x8xf32>
    %114 = arith.subf %17, %113 : vector<2x8xf32>
    %115 = arith.mulf %114, %114 : vector<2x8xf32>
    %cst_51 = arith.constant 0.000000e+00 : f32
    %116 = vector.broadcast %cst_51 : f32 to vector<2x8xf32>
    %117 = arith.subf %116, %115 : vector<2x8xf32>
    %cst_52 = arith.constant 5.000000e+01 : f32
    %118 = vector.broadcast %cst_52 : f32 to vector<2x8xf32>
    %119 = arith.mulf %117, %118 : vector<2x8xf32>
    %120 = math.exp %119 : vector<2x8xf32>
    %cst_53 = arith.constant dense<0.000000e+00> : vector<2xf32>
    %121 = vector.multi_reduction <add>, %120, %cst_53 [1] : vector<2x8xf32> to vector<2xf32>
    %122 = vector.shape_cast %121 : vector<2xf32> to vector<2x1xf32>
    %cst_54 = arith.constant 0.899999976 : f32
    %123 = vector.broadcast %cst_54 : f32 to vector<2x8xf32>
    %124 = arith.subf %17, %123 : vector<2x8xf32>
    %125 = arith.mulf %124, %124 : vector<2x8xf32>
    %cst_55 = arith.constant 0.000000e+00 : f32
    %126 = vector.broadcast %cst_55 : f32 to vector<2x8xf32>
    %127 = arith.subf %126, %125 : vector<2x8xf32>
    %cst_56 = arith.constant 5.000000e+01 : f32
    %128 = vector.broadcast %cst_56 : f32 to vector<2x8xf32>
    %129 = arith.mulf %127, %128 : vector<2x8xf32>
    %130 = math.exp %129 : vector<2x8xf32>
    %cst_57 = arith.constant dense<0.000000e+00> : vector<2xf32>
    %131 = vector.multi_reduction <add>, %130, %cst_57 [1] : vector<2x8xf32> to vector<2xf32>
    %132 = vector.shape_cast %131 : vector<2xf32> to vector<2x1xf32>
    %cst_58 = arith.constant 1.000000e+00 : f32
    %133 = vector.broadcast %cst_58 : f32 to vector<2x8xf32>
    %134 = arith.subf %22, %133 : vector<2x8xf32>
    %135 = arith.mulf %134, %134 : vector<2x8xf32>
    %cst_59 = arith.constant 0.000000e+00 : f32
    %136 = vector.broadcast %cst_59 : f32 to vector<2x8xf32>
    %137 = arith.subf %136, %135 : vector<2x8xf32>
    %cst_60 = arith.constant 5.000000e+05 : f32
    %138 = vector.broadcast %cst_60 : f32 to vector<2x8xf32>
    %139 = arith.mulf %137, %138 : vector<2x8xf32>
    %140 = math.exp %139 : vector<2x8xf32>
    %cst_61 = arith.constant dense<0.000000e+00> : vector<2xf32>
    %141 = vector.multi_reduction <add>, %140, %cst_61 [1] : vector<2x8xf32> to vector<2xf32>
    %142 = vector.shape_cast %141 : vector<2xf32> to vector<2x1xf32>
    %cst_62 = arith.constant -0.899999976 : f32
    %143 = vector.broadcast %cst_62 : f32 to vector<2x8xf32>
    %144 = arith.subf %22, %143 : vector<2x8xf32>
    %145 = arith.mulf %144, %144 : vector<2x8xf32>
    %cst_63 = arith.constant 0.000000e+00 : f32
    %146 = vector.broadcast %cst_63 : f32 to vector<2x8xf32>
    %147 = arith.subf %146, %145 : vector<2x8xf32>
    %cst_64 = arith.constant 5.000000e+01 : f32
    %148 = vector.broadcast %cst_64 : f32 to vector<2x8xf32>
    %149 = arith.mulf %147, %148 : vector<2x8xf32>
    %150 = math.exp %149 : vector<2x8xf32>
    %cst_65 = arith.constant dense<0.000000e+00> : vector<2xf32>
    %151 = vector.multi_reduction <add>, %150, %cst_65 [1] : vector<2x8xf32> to vector<2xf32>
    %152 = vector.shape_cast %151 : vector<2xf32> to vector<2x1xf32>
    %cst_66 = arith.constant -0.699999988 : f32
    %153 = vector.broadcast %cst_66 : f32 to vector<2x8xf32>
    %154 = arith.subf %22, %153 : vector<2x8xf32>
    %155 = arith.mulf %154, %154 : vector<2x8xf32>
    %cst_67 = arith.constant 0.000000e+00 : f32
    %156 = vector.broadcast %cst_67 : f32 to vector<2x8xf32>
    %157 = arith.subf %156, %155 : vector<2x8xf32>
    %cst_68 = arith.constant 5.000000e+01 : f32
    %158 = vector.broadcast %cst_68 : f32 to vector<2x8xf32>
    %159 = arith.mulf %157, %158 : vector<2x8xf32>
    %160 = math.exp %159 : vector<2x8xf32>
    %cst_69 = arith.constant dense<0.000000e+00> : vector<2xf32>
    %161 = vector.multi_reduction <add>, %160, %cst_69 [1] : vector<2x8xf32> to vector<2xf32>
    %162 = vector.shape_cast %161 : vector<2xf32> to vector<2x1xf32>
    %cst_70 = arith.constant -5.000000e-01 : f32
    %163 = vector.broadcast %cst_70 : f32 to vector<2x8xf32>
    %164 = arith.subf %22, %163 : vector<2x8xf32>
    %165 = arith.mulf %164, %164 : vector<2x8xf32>
    %cst_71 = arith.constant 0.000000e+00 : f32
    %166 = vector.broadcast %cst_71 : f32 to vector<2x8xf32>
    %167 = arith.subf %166, %165 : vector<2x8xf32>
    %cst_72 = arith.constant 5.000000e+01 : f32
    %168 = vector.broadcast %cst_72 : f32 to vector<2x8xf32>
    %169 = arith.mulf %167, %168 : vector<2x8xf32>
    %170 = math.exp %169 : vector<2x8xf32>
    %cst_73 = arith.constant dense<0.000000e+00> : vector<2xf32>
    %171 = vector.multi_reduction <add>, %170, %cst_73 [1] : vector<2x8xf32> to vector<2xf32>
    %172 = vector.shape_cast %171 : vector<2xf32> to vector<2x1xf32>
    %cst_74 = arith.constant -3.000000e-01 : f32
    %173 = vector.broadcast %cst_74 : f32 to vector<2x8xf32>
    %174 = arith.subf %22, %173 : vector<2x8xf32>
    %175 = arith.mulf %174, %174 : vector<2x8xf32>
    %cst_75 = arith.constant 0.000000e+00 : f32
    %176 = vector.broadcast %cst_75 : f32 to vector<2x8xf32>
    %177 = arith.subf %176, %175 : vector<2x8xf32>
    %cst_76 = arith.constant 5.000000e+01 : f32
    %178 = vector.broadcast %cst_76 : f32 to vector<2x8xf32>
    %179 = arith.mulf %177, %178 : vector<2x8xf32>
    %180 = math.exp %179 : vector<2x8xf32>
    %cst_77 = arith.constant dense<0.000000e+00> : vector<2xf32>
    %181 = vector.multi_reduction <add>, %180, %cst_77 [1] : vector<2x8xf32> to vector<2xf32>
    %182 = vector.shape_cast %181 : vector<2xf32> to vector<2x1xf32>
    %cst_78 = arith.constant -1.000000e-01 : f32
    %183 = vector.broadcast %cst_78 : f32 to vector<2x8xf32>
    %184 = arith.subf %22, %183 : vector<2x8xf32>
    %185 = arith.mulf %184, %184 : vector<2x8xf32>
    %cst_79 = arith.constant 0.000000e+00 : f32
    %186 = vector.broadcast %cst_79 : f32 to vector<2x8xf32>
    %187 = arith.subf %186, %185 : vector<2x8xf32>
    %cst_80 = arith.constant 5.000000e+01 : f32
    %188 = vector.broadcast %cst_80 : f32 to vector<2x8xf32>
    %189 = arith.mulf %187, %188 : vector<2x8xf32>
    %190 = math.exp %189 : vector<2x8xf32>
    %cst_81 = arith.constant dense<0.000000e+00> : vector<2xf32>
    %191 = vector.multi_reduction <add>, %190, %cst_81 [1] : vector<2x8xf32> to vector<2xf32>
    %192 = vector.shape_cast %191 : vector<2xf32> to vector<2x1xf32>
    %cst_82 = arith.constant 1.000000e-01 : f32
    %193 = vector.broadcast %cst_82 : f32 to vector<2x8xf32>
    %194 = arith.subf %22, %193 : vector<2x8xf32>
    %195 = arith.mulf %194, %194 : vector<2x8xf32>
    %cst_83 = arith.constant 0.000000e+00 : f32
    %196 = vector.broadcast %cst_83 : f32 to vector<2x8xf32>
    %197 = arith.subf %196, %195 : vector<2x8xf32>
    %cst_84 = arith.constant 5.000000e+01 : f32
    %198 = vector.broadcast %cst_84 : f32 to vector<2x8xf32>
    %199 = arith.mulf %197, %198 : vector<2x8xf32>
    %200 = math.exp %199 : vector<2x8xf32>
    %cst_85 = arith.constant dense<0.000000e+00> : vector<2xf32>
    %201 = vector.multi_reduction <add>, %200, %cst_85 [1] : vector<2x8xf32> to vector<2xf32>
    %202 = vector.shape_cast %201 : vector<2xf32> to vector<2x1xf32>
    %cst_86 = arith.constant 3.000000e-01 : f32
    %203 = vector.broadcast %cst_86 : f32 to vector<2x8xf32>
    %204 = arith.subf %22, %203 : vector<2x8xf32>
    %205 = arith.mulf %204, %204 : vector<2x8xf32>
    %cst_87 = arith.constant 0.000000e+00 : f32
    %206 = vector.broadcast %cst_87 : f32 to vector<2x8xf32>
    %207 = arith.subf %206, %205 : vector<2x8xf32>
    %cst_88 = arith.constant 5.000000e+01 : f32
    %208 = vector.broadcast %cst_88 : f32 to vector<2x8xf32>
    %209 = arith.mulf %207, %208 : vector<2x8xf32>
    %210 = math.exp %209 : vector<2x8xf32>
    %cst_89 = arith.constant dense<0.000000e+00> : vector<2xf32>
    %211 = vector.multi_reduction <add>, %210, %cst_89 [1] : vector<2x8xf32> to vector<2xf32>
    %212 = vector.shape_cast %211 : vector<2xf32> to vector<2x1xf32>
    %cst_90 = arith.constant 5.000000e-01 : f32
    %213 = vector.broadcast %cst_90 : f32 to vector<2x8xf32>
    %214 = arith.subf %22, %213 : vector<2x8xf32>
    %215 = arith.mulf %214, %214 : vector<2x8xf32>
    %cst_91 = arith.constant 0.000000e+00 : f32
    %216 = vector.broadcast %cst_91 : f32 to vector<2x8xf32>
    %217 = arith.subf %216, %215 : vector<2x8xf32>
    %cst_92 = arith.constant 5.000000e+01 : f32
    %218 = vector.broadcast %cst_92 : f32 to vector<2x8xf32>
    %219 = arith.mulf %217, %218 : vector<2x8xf32>
    %220 = math.exp %219 : vector<2x8xf32>
    %cst_93 = arith.constant dense<0.000000e+00> : vector<2xf32>
    %221 = vector.multi_reduction <add>, %220, %cst_93 [1] : vector<2x8xf32> to vector<2xf32>
    %222 = vector.shape_cast %221 : vector<2xf32> to vector<2x1xf32>
    %cst_94 = arith.constant 0.699999988 : f32
    %223 = vector.broadcast %cst_94 : f32 to vector<2x8xf32>
    %224 = arith.subf %22, %223 : vector<2x8xf32>
    %225 = arith.mulf %224, %224 : vector<2x8xf32>
    %cst_95 = arith.constant 0.000000e+00 : f32
    %226 = vector.broadcast %cst_95 : f32 to vector<2x8xf32>
    %227 = arith.subf %226, %225 : vector<2x8xf32>
    %cst_96 = arith.constant 5.000000e+01 : f32
    %228 = vector.broadcast %cst_96 : f32 to vector<2x8xf32>
    %229 = arith.mulf %227, %228 : vector<2x8xf32>
    %230 = math.exp %229 : vector<2x8xf32>
    %cst_97 = arith.constant dense<0.000000e+00> : vector<2xf32>
    %231 = vector.multi_reduction <add>, %230, %cst_97 [1] : vector<2x8xf32> to vector<2xf32>
    %232 = vector.shape_cast %231 : vector<2xf32> to vector<2x1xf32>
    %cst_98 = arith.constant 0.899999976 : f32
    %233 = vector.broadcast %cst_98 : f32 to vector<2x8xf32>
    %234 = arith.subf %22, %233 : vector<2x8xf32>
    %235 = arith.mulf %234, %234 : vector<2x8xf32>
    %cst_99 = arith.constant 0.000000e+00 : f32
    %236 = vector.broadcast %cst_99 : f32 to vector<2x8xf32>
    %237 = arith.subf %236, %235 : vector<2x8xf32>
    %cst_100 = arith.constant 5.000000e+01 : f32
    %238 = vector.broadcast %cst_100 : f32 to vector<2x8xf32>
    %239 = arith.mulf %237, %238 : vector<2x8xf32>
    %240 = math.exp %239 : vector<2x8xf32>
    %cst_101 = arith.constant dense<0.000000e+00> : vector<2xf32>
    %241 = vector.multi_reduction <add>, %240, %cst_101 [1] : vector<2x8xf32> to vector<2xf32>
    %242 = vector.shape_cast %241 : vector<2xf32> to vector<2x1xf32>
    %243 = tpu.concatenate %32, %42, %52, %62, %72, %82, %92, %102, %112, %122, %132, %142, %152, %162, %172, %182 in 1 : vector<2x1xf32>, vector<2x1xf32>, vector<2x1xf32>, vector<2x1xf32>, vector<2x1xf32>, vector<2x1xf32>, vector<2x1xf32>, vector<2x1xf32>, vector<2x1xf32>, vector<2x1xf32>, vector<2x1xf32>, vector<2x1xf32>, vector<2x1xf32>, vector<2x1xf32>, vector<2x1xf32>, vector<2x1xf32> -> vector<2x16xf32>
    %244 = tpu.concatenate %192, %202, %212, %222, %232, %242 in 1 : vector<2x1xf32>, vector<2x1xf32>, vector<2x1xf32>, vector<2x1xf32>, vector<2x1xf32>, vector<2x1xf32> -> vector<2x6xf32>
    %245 = tpu.concatenate %243, %244 in 1 : vector<2x16xf32>, vector<2x6xf32> -> vector<2x22xf32>
    %c0_i32 = arith.constant 0 : i32
    %246 = arith.cmpi eq, %arg1, %c0_i32 : i32
    %247 = arith.extui %246 : i1 to i32
    %c0_i32_102 = arith.constant 0 : i32
    %248 = arith.cmpi ne, %247, %c0_i32_102 : i32
    scf.if %248 {
      %cst_109 = arith.constant 0.000000e+00 : f32
      %255 = vector.broadcast %cst_109 : f32 to vector<2x22xf32>
      %c0_110 = arith.constant 0 : index
      %c0_111 = arith.constant 0 : index
      %256 = vector.load %arg6[%c0_110, %c0_111] : memref<2x22xf32, #tpu.memory_space<vmem>>, vector<2x22xf32>
      tpu.vector_store %arg6[%c0_110, %c0_111], %255 {strides = array<i32>} : memref<2x22xf32, #tpu.memory_space<vmem>>, vector<2x22xf32>,
    } else {
    }
    %c0_103 = arith.constant 0 : index
    %c0_104 = arith.constant 0 : index
    %249 = vector.load %arg6[%c0_103, %c0_104] : memref<2x22xf32, #tpu.memory_space<vmem>>, vector<2x22xf32>
    %250 = arith.addf %249, %245 : vector<2x22xf32>
    %c0_105 = arith.constant 0 : index
    %c0_106 = arith.constant 0 : index
    %251 = vector.load %arg6[%c0_105, %c0_106] : memref<2x22xf32, #tpu.memory_space<vmem>>, vector<2x22xf32>
    tpu.vector_store %arg6[%c0_105, %c0_106], %250 {strides = array<i32>} : memref<2x22xf32, #tpu.memory_space<vmem>>, vector<2x22xf32>,
    %c0_i32_107 = arith.constant 0 : i32
    %252 = arith.cmpi eq, %arg1, %c0_i32_107 : i32
    %253 = arith.extui %252 : i1 to i32
    %c0_i32_108 = arith.constant 0 : i32
    %254 = arith.cmpi ne, %253, %c0_i32_108 : i32
    scf.if %254 {
      %c0_109 = arith.constant 0 : index
      %c0_110 = arith.constant 0 : index
      %255 = vector.load %arg6[%c0_109, %c0_110] : memref<2x22xf32, #tpu.memory_space<vmem>>, vector<2x22xf32>
      %c0_111 = arith.constant 0 : index
      %c0_112 = arith.constant 0 : index
      %256 = vector.load %arg5[%c0_111, %c0_112] : memref<2x22xf32, #tpu.memory_space<vmem>>, vector<2x22xf32>
      tpu.vector_store %arg5[%c0_111, %c0_112], %255 {strides = array<i32>} : memref<2x22xf32, #tpu.memory_space<vmem>>, vector<2x22xf32>,
    } else {
    }
    return
  }
  func.func @transform_0(%arg0: i32, %arg1: i32) -> (i32, i32, i32) {
    %c0_i32 = arith.constant 0 : i32
    %c0_i32_0 = arith.constant 0 : i32
    return %arg0, %arg1, %c0_i32 : i32, i32, i32
  }
  func.func @transform_1(%arg0: i32, %arg1: i32) -> (i32, i32, i32) {
    %c0_i32 = arith.constant 0 : i32
    %c0_i32_0 = arith.constant 0 : i32
    return %arg0, %arg1, %c0_i32 : i32, i32, i32
  }
  func.func @transform_2(%arg0: i32, %arg1: i32) -> (i32, i32, i32) {
    %c0_i32 = arith.constant 0 : i32
    %c0_i32_0 = arith.constant 0 : i32
    return %arg0, %arg1, %c0_i32 : i32, i32, i32
  }
  func.func @transform_3(%arg0: i32, %arg1: i32) -> (i32, i32) {
    %c0_i32 = arith.constant 0 : i32
    %c0_i32_0 = arith.constant 0 : i32
    return %arg0, %c0_i32 : i32, i32
  }
}

</mosaic_0001>

<bundles_post_ra>
// kernel: kernel_interaction_model.1
= control target key start
LH: loop header
LB: loop body
LE: loop exit
PB: predicated region body
PF: predicated region fallthrough
CT: control target
= control target key end

     0   :  { %8 = vsyncpa [#allocation4], 0  ;;  %s1178_s0 = inlined_call_operand.hbm [shape: f32[2,8,32], index: 0, kind: input, shape index: {}]   ;;  %s1179_s1 = inlined_call_operand.hbm [shape: f32[2,8,32], index: 1, kind: input, shape index: {}]   ;;  %s1180_s2 = inlined_call_operand.hbm [shape: f32[2,8,32], index: 2, kind: input, shape index: {}]   ;;  %s1181_s3 = inlined_call_operand.hbm [shape: f32[2,22], index: 3, kind: output, shape index: {}]  }
   0x1   :  { %9 = vsyncpa [#allocation7], 0 }
   0x2   :  { %10 = vsyncpa [#allocation5], 0  ;;  %s28_s14 = sshll.u32 %s1179_s1, 4  ;;  %s951_s15 = smov [#allocation6]   ;;  %s29_s14 = int_to_ptr.hbm [resolvable:$true] %s28_s14 }
   0x3   :  { %s30_s16 = sshll.u32 %s951_s15, 4  ;;  %s15_s19 = sshll.u32 %s1178_s0, 4  ;;  %s31_s16 = int_to_ptr.vmem [resolvable:$true] %s30_s16  ;;  %s16_s19 = int_to_ptr.hbm [resolvable:$true] %s15_s19 }
   0x4   :  { %s952_s20 = smov 128   ;;  %s953_s21 = smov 8  }
   0x5   :  { %36 = dma.hbm_to_vmem [thread:$0]  %s29_s14, 256, %s31_s16, [#allocation7], %s952_s20, %s952_s20, %s953_s21  }
   0x6   :  { %s954_s22 = smov [#allocation3]   ;;  %s41_s26 = sshll.u32 %s1180_s2, 4  ;;  %s42_s26 = int_to_ptr.hbm [resolvable:$true] %s41_s26 }
   0x7   :  { %s17_s23 = sshll.u32 %s954_s22, 4  ;;  %s955_s1 = smov [#allocation8]   ;;  %s18_s23 = int_to_ptr.vmem [resolvable:$true] %s17_s23 }
   0x8   :  { %23 = dma.hbm_to_vmem [thread:$0]  %s16_s19, 256, %s18_s23, [#allocation4], %s952_s20, %s952_s20, %s953_s21  }
   0x9   :  { %s43_s27 = sshll.u32 %s955_s1, 4  ;;  %s44_s27 = int_to_ptr.vmem [resolvable:$true] %s43_s27 }
   0xa   :  { %49 = dma.hbm_to_vmem [thread:$0]  %s42_s26, 256, %s44_s27, [#allocation7], %s952_s20, %s952_s20, %s953_s21  }
   0xb   :  { %945 = dma.done.wait [#allocation4], 256  }
   0xc   :  { %946 = vsyncadd [#allocation4], 4294967040 }
   0xd   :  { %947 = dma.done.wait [#allocation7], 512  }
   0xe   :  { %948 = vsyncadd [#allocation7], 4294966784  ;;  %v66_v0 = vld [vmem:[#allocation8] sm:$0xff]  ;;  %vm70_vm0 = vcmask 261120   ;;  %v67_v5 = vld [vmem:[#allocation8 + $0x8] sm:$0xff]  ;;  %v175_v49 = vlaneseq  ;;  %vm179_vm13 = vcmask 1041409  }
   0xf   :  { %v62_v1 = vld [vmem:[#allocation3] sm:$0xff]  ;;  %v85_v2 = vmul.f32 %v66_v0, %v66_v0  ;;  %v63_v6 = vld [vmem:[#allocation3 + $0x8] sm:$0xff]  ;;  %v86_v10 = vmul.f32 %v67_v5, %v67_v5  ;;  %v65_v15 = vld [vmem:[#allocation6 + $0x8] sm:$0xff]  ;;  %vm182_vm14 = vcmask 58368   ;;  %vm627_vm15 = vcmask 7168   ;;  %s956_s0 = smov 16  }
  0x10   :  { %v68_v3 = vmul.f32 %v62_v1, %v62_v1  ;;  %v101_v4 = vmul.f32 %v66_v0, %v62_v1  ;;  %v69_v11 = vmul.f32 %v63_v6, %v63_v6  ;;  %v102_v12 = vmul.f32 %v67_v5, %v63_v6  ;;  %v64_v16 = vld [vmem:[#allocation6] sm:$0xff]  ;;  %s958_s2 = smov [#allocation9]   ;;  %s690_s4 = sshll.u32 %s1181_s3, 4  ;;  %s691_s4 = int_to_ptr.hbm [resolvable:$true] %s690_s4 }
  0x11   :  { %v87_v7 = vsel %vm70_vm0, %v85_v2, 0.0  ;;  %v90_v13 = vsel %vm70_vm0, %v86_v10, 0.0  ;;  %v78_v18 = vmul.f32 %v65_v15, %v65_v15  ;;  %v77_v19 = vmul.f32 %v64_v16, %v64_v16  ;;  %s688_s28 = sshll.u32 %s958_s2, 4  ;;  %s689_s28 = int_to_ptr.vmem [resolvable:$true] %s688_s28 }
  0x12   :  { %v71_v8 = vsel %vm70_vm0, %v68_v3, 0.0  ;;  %v103_v9 = vsel %vm70_vm0, %v101_v4, 0.0  ;;  %88 = vadd.xlane.f32.xlu1 %v87_v7  ;;  %v74_v14 = vsel %vm70_vm0, %v69_v11, 0.0  ;;  %v106_v17 = vsel %vm70_vm0, %v102_v12, 0.0 }
  0x13   :  { %72 = vadd.xlane.f32.xlu0 %v71_v8  ;;  %104 = vadd.xlane.f32.xlu2 %v103_v9  ;;  %v93_v20 = vmul.f32 %v64_v16, %v62_v1  ;;  %v82_v21 = vsel %vm70_vm0, %v78_v18, 0.0  ;;  %v79_v22 = vsel %vm70_vm0, %v77_v19, 0.0  ;;  %v94_v24 = vmul.f32 %v65_v15, %v63_v6 }
  0x14   :  { %v1006_v54 = vand.u32 127, %v175_v49 }
  0x15   :  { %v95_v23 = vsel %vm70_vm0, %v93_v20, 0.0  ;;  %v98_v25 = vsel %vm70_vm0, %v94_v24, 0.0  ;;  %vm629_vm0 = vcmask 15360  }
  0x1a   :  { %91 = vadd.xlane.f32.xlu1 %v90_v13 }
  0x1b   :  { %75 = vadd.xlane.f32.xlu0 %v74_v14  ;;  %107 = vadd.xlane.f32.xlu2 %v106_v17 }
  0x22   :  { %83 = vadd.xlane.f32.xlu1 %v82_v21 }
  0x23   :  { %80 = vadd.xlane.f32.xlu0 %v79_v22  ;;  %96 = vadd.xlane.f32.xlu2 %v95_v23 }
  0x2b   :  { %99 = vadd.xlane.f32.xlu0 %v98_v25 }
  0x85   :  { %v89_v26 = vpop.xlane.xlu1 %88 }
  0x86   :  { %v73_v27 = vpop.xlane.xlu0 %72  ;;  %v105_v42 = vpop.xlane.xlu2 %104 }
  0x87   :  { %v135_v28 = vmul.f32 %v89_v26, %v73_v27 }
  0x89   :  { %v137_v29 = vmax.f32 %v135_v28, 1e-12 }
  0x8b   :  { %753 = vrsqrt.f32 %v137_v29  ;;  %vm145_vm2 = vweird.f32 %v137_v29 }
  0x8d   :  { %v92_v30 = vpop.xlane.xlu1 %91 }
  0x8e   :  { %v76_v31 = vpop.xlane.xlu0 %75  ;;  %v108_v62 = vpop.xlane.xlu2 %107 }
  0x8f   :  { %v136_v32 = vmul.f32 %v92_v30, %v76_v31 }
  0x91   :  { %v754_v33 = vpop.eup %753  ;;  %v138_v34 = vmax.f32 %v136_v32, 1e-12 }
  0x92   :  { %v140_v35 = vmul.f32 %v754_v33, %v137_v29  ;;  %vm146_vm1 = vweird.f32 %v754_v33 }
  0x93   :  { %755 = vrsqrt.f32 %v138_v34  ;;  %vm147_vm3 = vmor %vm145_vm2, %vm146_vm1  ;;  %vm155_vm4 = vweird.f32 %v138_v34  ;;  %vm631_vm1 = vcmask 23552   ;;  %vm633_vm2 = vcmask 31744  }
  0x94   :  { %v141_v36 = vmul.f32 %v754_v33, %v140_v35 }
  0x95   :  { %v84_v37 = vpop.xlane.xlu1 %83 }
  0x96   :  { %v81_v38 = vpop.xlane.xlu0 %80  ;;  %v142_v39 = vmul.f32 0.5, %v141_v36  ;;  %v110_v40 = vmul.f32 %v84_v37, %v76_v31  ;;  %v97_v37 = vpop.xlane.xlu2 %96 }
  0x97   :  { %v109_v41 = vmul.f32 %v81_v38, %v73_v27 }
  0x98   :  { %v143_v43 = vsub.f32 1.5, %v142_v39  ;;  %v998_v45 = vmax.f32 %v110_v40, 1e-12 }
  0x99   :  { %v756_v44 = vpop.eup %755  ;;  %v1000_v46 = vmax.f32 %v109_v41, 1e-12 }
  0x9a   :  { %v150_v47 = vmul.f32 %v756_v44, %v138_v34  ;;  %v144_v48 = vmul.f32 %v754_v33, %v143_v43  ;;  %757 = vrsqrt.f32 %v998_v45  ;;  %vm156_vm5 = vweird.f32 %v756_v44 }
  0x9b   :  { %759 = vrsqrt.f32 %v1000_v46  ;;  %vm129_vm6 = vweird.f32 %v998_v45  ;;  %vm157_vm8 = vmor %vm155_vm4, %vm156_vm5  ;;  %vm119_vm9 = vweird.f32 %v1000_v46  ;;  %vm672_vm4 = vcmask 173056  }
  0x9c   :  { %v151_v50 = vmul.f32 %v756_v44, %v150_v47  ;;  %v148_v51 = vsel %vm147_vm3, %v754_v33, %v144_v48  ;;  %vm635_vm3 = vcmask 39936   ;;  %vm637_vm5 = vcmask 48128  }
  0x9d   :  { %v1004_v52 = vmul.f32 %v148_v51, %v105_v42 }
  0x9e   :  { %v152_v53 = vmul.f32 0.5, %v151_v50  ;;  %v100_v34 = vpop.xlane.xlu0 %99 }
  0x9f   :  { %v737_v55 = vadd.f32 -0.3, %v1004_v52  ;;  %v735_v56 = vadd.f32 -0.1, %v1004_v52  ;;  %v733_v57 = vadd.f32 0.1, %v1004_v52 }
  0xa0   :  { %v153_v58 = vsub.f32 1.5, %v152_v53  ;;  %v743_v59 = vadd.f32 -0.9, %v1004_v52  ;;  %v741_v60 = vadd.f32 -0.7, %v1004_v52  ;;  %v758_v61 = vpop.eup %757  ;;  %v1014_v2 = vadd.f32 -0.5, %v1004_v52 }
  0xa1   :  { %v545_v63 = vmul.f32 %v737_v55, %v737_v55  ;;  %v524_v0 = vmul.f32 %v735_v56, %v735_v56  ;;  %v503_v1 = vmul.f32 %v733_v57, %v733_v57  ;;  %v760_v3 = vpop.eup %759  ;;  %v124_v4 = vmul.f32 %v758_v61, %v998_v45 }
  0xa2   :  { %v154_v5 = vmul.f32 %v756_v44, %v153_v58  ;;  %vm130_vm7 = vweird.f32 %v758_v61  ;;  %v608_v6 = vmul.f32 %v743_v59, %v743_v59  ;;  %v114_v7 = vmul.f32 %v760_v3, %v1000_v46 }
  0xa3   :  { %vm120_vm10 = vweird.f32 %v760_v3  ;;  %v547_v8 = vsub.f32 0.0, %v545_v63  ;;  %v526_v9 = vsub.f32 0.0, %v524_v0  ;;  %v125_v10 = vmul.f32 %v758_v61, %v124_v4  ;;  %vm131_vm11 = vmor %vm129_vm6, %vm130_vm7 }
  0xa4   :  { %v158_v11 = vsel %vm157_vm8, %v756_v44, %v154_v5  ;;  %v505_v12 = vsub.f32 0.0, %v503_v1  ;;  %v610_v13 = vsub.f32 0.0, %v608_v6  ;;  %v115_v14 = vmul.f32 %v760_v3, %v114_v7  ;;  %vm121_vm12 = vmor %vm119_vm9, %vm120_vm10 }
  0xa5   :  { %v1022_v15 = vmul.f32 %v158_v11, %v108_v62  ;;  %v549_v16 = vmul.f32 50.0, %v547_v8  ;;  %v528_v17 = vmul.f32 50.0, %v526_v9  ;;  %v126_v18 = vmul.f32 0.5, %v125_v10 }
  0xa6   :  { %v507_v19 = vmul.f32 50.0, %v505_v12  ;;  %v612_v20 = vmul.f32 50.0, %v610_v13  ;;  %v587_v21 = vmul.f32 %v741_v60, %v741_v60  ;;  %v116_v22 = vmul.f32 0.5, %v115_v14 }
  0xa7   :  { %v738_v23 = vadd.f32 -0.3, %v1022_v15  ;;  %v551_v24 = vmul.f32 1.442695, %v549_v16  ;;  %v740_v25 = vadd.f32 -0.5, %v1022_v15  ;;  %v127_v26 = vsub.f32 1.5, %v126_v18 }
  0xa8   :  { %v736_v27 = vadd.f32 -0.1, %v1022_v15  ;;  %v530_v28 = vmul.f32 1.442695, %v528_v17  ;;  %v589_v29 = vsub.f32 0.0, %v587_v21  ;;  %v117_v30 = vsub.f32 1.5, %v116_v22 }
  0xa9   :  { %v546_v31 = vmul.f32 %v738_v23, %v738_v23  ;;  %761 = vpow2.f32 %v551_v24  ;;  %v734_v32 = vadd.f32 0.1, %v1022_v15  ;;  %v128_v33 = vmul.f32 %v758_v61, %v127_v26 }
  0xaa   :  { %v525_v35 = vmul.f32 %v736_v27, %v736_v27  ;;  %763 = vpow2.f32 %v530_v28  ;;  %v509_v36 = vmul.f32 1.442695, %v507_v19  ;;  %v118_v38 = vmul.f32 %v760_v3, %v117_v30 }
  0xab   :  { %v548_v39 = vsub.f32 0.0, %v546_v31  ;;  %v504_v40 = vmul.f32 %v734_v32, %v734_v32  ;;  %v744_v41 = vadd.f32 -0.9, %v1022_v15  ;;  %v132_v42 = vsel %vm131_vm11, %v758_v61, %v128_v33 }
  0xac   :  { %v527_v43 = vsub.f32 0.0, %v525_v35  ;;  %765 = vpow2.f32 %v509_v36  ;;  %v614_v44 = vmul.f32 1.442695, %v612_v20  ;;  %v122_v47 = vsel %vm121_vm12, %v760_v3, %v118_v38 }
  0xad   :  { %v1035_v48 = vmul.f32 %v132_v42, %v100_v34  ;;  %v550_v49 = vmul.f32 50.0, %v548_v39  ;;  %v506_v50 = vsub.f32 0.0, %v504_v40  ;;  %v1037_v51 = vmul.f32 %v122_v47, %v97_v37 }
  0xae   :  { %v529_v45 = vmul.f32 50.0, %v527_v43  ;;  %v609_v53 = vmul.f32 %v744_v41, %v744_v41  ;;  %767 = vpow2.f32 %v614_v44  ;;  %v742_v46 = vadd.f32 -0.7, %v1022_v15 }
  0xaf   :  { %v762_v55 = vpop.eup %761  ;;  %v553_v56 = vmul.f32 1.442695, %v550_v49  ;;  %v508_v57 = vmul.f32 50.0, %v506_v50  ;;  %v591_v58 = vmul.f32 50.0, %v589_v29  ;;  %v566_v63 = vmul.f32 %v1014_v2, %v1014_v2 }
  0xb0   :  { %v764_v59 = vpop.eup %763  ;;  %v557_v60 = vperm.slane %v762_v55, %v1006_v54  ;;  %v532_v61 = vmul.f32 1.442695, %v529_v45  ;;  %v611_v62 = vsub.f32 0.0, %v609_v53  ;;  %v588_v3 = vmul.f32 %v742_v46, %v742_v46 }
  0xb1   :  { %769 = vpow2.f32 %v553_v56  ;;  %v536_v0 = vperm.slane %v764_v59, %v1006_v54  ;;  %v511_v1 = vmul.f32 1.442695, %v508_v57  ;;  %v593_v6 = vmul.f32 1.442695, %v591_v58 }
  0xb2   :  { %v766_v4 = vpop.eup %765  ;;  %771 = vpow2.f32 %v532_v61  ;;  %v613_v5 = vmul.f32 50.0, %v611_v62  ;;  %v567_v7 = vmul.f32 %v740_v25, %v740_v25  ;;  %v590_v9 = vsub.f32 0.0, %v588_v3 }
  0xb3   :  { %773 = vpow2.f32 %v511_v1  ;;  %v515_v8 = vperm.slane %v766_v4, %v1006_v54  ;;  %v568_v10 = vsub.f32 0.0, %v566_v63  ;;  %v705_v2 = vadd.f32 0.7, %v1037_v51 }
  0xb4   :  { %v768_v11 = vpop.eup %767  ;;  %v616_v12 = vmul.f32 1.442695, %v613_v5  ;;  %775 = vpow2.f32 %v593_v6  ;;  %v569_v13 = vsub.f32 0.0, %v567_v7  ;;  %v592_v16 = vmul.f32 50.0, %v590_v9 }
  0xb5   :  { %v620_v14 = vperm.slane %v768_v11, %v1006_v54  ;;  %v570_v17 = vmul.f32 50.0, %v568_v10  ;;  %v706_v18 = vadd.f32 0.7, %v1035_v48  ;;  %v209_v20 = vmul.f32 %v705_v2, %v705_v2 }
  0xb6   :  { %777 = vpow2.f32 %v616_v12  ;;  %v571_v19 = vmul.f32 50.0, %v569_v13  ;;  %v703_v21 = vadd.f32 0.9, %v1037_v51  ;;  %v595_v23 = vmul.f32 1.442695, %v592_v16 }
  0xb7   :  { %v770_v22 = vpop.eup %769  ;;  %v572_v24 = vmul.f32 1.442695, %v570_v17  ;;  %v210_v25 = vmul.f32 %v706_v18, %v706_v18  ;;  %v704_v26 = vadd.f32 0.9, %v1035_v48  ;;  %v211_v30 = vsub.f32 0.0, %v209_v20 }
  0xb8   :  { %v772_v27 = vpop.eup %771  ;;  %v558_v28 = vperm.slane %v770_v22, %v1006_v54  ;;  %v574_v29 = vmul.f32 1.442695, %v571_v19  ;;  %v188_v31 = vmul.f32 %v703_v21, %v703_v21  ;;  %779 = vpow2.f32 %v595_v23 }
  0xb9   :  { %v774_v32 = vpop.eup %773  ;;  %v537_v33 = vperm.slane %v772_v27, %v1006_v54  ;;  %v212_v34 = vsub.f32 0.0, %v210_v25  ;;  %v189_v35 = vmul.f32 %v704_v26, %v704_v26  ;;  %781 = vpow2.f32 %v572_v24 }
  0xba   :  { %v776_v36 = vpop.eup %775  ;;  %v559_v37 = vsel %vm179_vm13, %v558_v28, %v557_v60  ;;  %v516_v38 = vperm.slane %v774_v32, %v1006_v54  ;;  %v213_v39 = vmul.f32 50.0, %v211_v30  ;;  %783 = vpow2.f32 %v574_v29 }
  0xbb   :  { %v561_v40 = vsel %vm182_vm14, %v559_v37, 0.0  ;;  %v538_v41 = vsel %vm179_vm13, %v537_v33, %v536_v0  ;;  %v599_v42 = vperm.slane %v776_v36, %v1006_v54  ;;  %v214_v49 = vmul.f32 50.0, %v212_v34 }
  0xbc   :  { %v778_v43 = vpop.eup %777  ;;  %562 = vadd.xlane.f32.xlu0 %v561_v40  ;;  %v540_v44 = vsel %vm182_vm14, %v538_v41, 0.0  ;;  %v517_v47 = vsel %vm179_vm13, %v516_v38, %v515_v8  ;;  %v215_v50 = vmul.f32 1.442695, %v213_v39  ;;  %v190_v55 = vsub.f32 0.0, %v188_v31 }
  0xbd   :  { %541 = vadd.xlane.f32.xlu2 %v540_v44  ;;  %v519_v45 = vsel %vm182_vm14, %v517_v47, 0.0  ;;  %v621_v53 = vperm.slane %v778_v43, %v1006_v54  ;;  %v191_v56 = vsub.f32 0.0, %v189_v35  ;;  %v217_v57 = vmul.f32 1.442695, %v214_v49 }
  0xbe   :  { %520 = vadd.xlane.f32.xlu1 %v519_v45  ;;  %785 = vpow2.f32 %v215_v50  ;;  %v701_v46 = vadd.f32 -1.0, %v1037_v51  ;;  %v702_v58 = vadd.f32 -1.0, %v1035_v48  ;;  %v780_v59 = vpop.eup %779  ;;  %v192_v61 = vmul.f32 50.0, %v190_v55 }
  0xbf   :  { %v622_v60 = vsel %vm179_vm13, %v621_v53, %v620_v14  ;;  %v193_v62 = vmul.f32 50.0, %v191_v56  ;;  %v711_v63 = vadd.f32 0.1, %v1037_v51  ;;  %v782_v0 = vpop.eup %781  ;;  %v600_v3 = vperm.slane %v780_v59, %v1006_v54 }
  0xc0   :  { %v624_v1 = vsel %vm182_vm14, %v622_v60, 0.0  ;;  %787 = vpow2.f32 %v217_v57  ;;  %v163_v4 = vmul.f32 %v701_v46, %v701_v46  ;;  %v784_v5 = vpop.eup %783  ;;  %v578_v6 = vperm.slane %v782_v0, %v1006_v54 }
  0xc1   :  { %v194_v7 = vmul.f32 1.442695, %v192_v61  ;;  %v196_v8 = vmul.f32 1.442695, %v193_v62  ;;  %v164_v9 = vmul.f32 %v702_v58, %v702_v58  ;;  %v601_v10 = vsel %vm179_vm13, %v600_v3, %v599_v42 }
  0xc2   :  { %v579_v11 = vperm.slane %v784_v5, %v1006_v54  ;;  %v165_v12 = vsub.f32 0.0, %v163_v4  ;;  %v712_v13 = vadd.f32 0.1, %v1035_v48  ;;  %v603_v2 = vsel %vm182_vm14, %v601_v10, 0.0 }
  0xc3   :  { %789 = vpow2.f32 %v194_v7  ;;  %v166_v14 = vsub.f32 0.0, %v164_v9  ;;  %v272_v16 = vmul.f32 %v711_v63, %v711_v63  ;;  %v709_v28 = vadd.f32 0.3, %v1037_v51 }
  0xc4   :  { %v786_v17 = vpop.eup %785  ;;  %625 = vadd.xlane.f32.xlu0 %v624_v1  ;;  %v580_v18 = vsel %vm179_vm13, %v579_v11, %v578_v6  ;;  %791 = vpow2.f32 %v196_v8  ;;  %v167_v19 = vmul.f32 500000.0, %v165_v12  ;;  %v273_v20 = vmul.f32 %v712_v13, %v712_v13 }
  0xc5   :  { %604 = vadd.xlane.f32.xlu2 %v603_v2  ;;  %v582_v21 = vsel %vm182_vm14, %v580_v18, 0.0  ;;  %v221_v22 = vperm.slane %v786_v17, %v1006_v54  ;;  %v168_v23 = vmul.f32 500000.0, %v166_v14  ;;  %v274_v24 = vsub.f32 0.0, %v272_v16 }
  0xc6   :  { %v788_v25 = vpop.eup %787  ;;  %583 = vadd.xlane.f32.xlu1 %v582_v21  ;;  %v169_v26 = vmul.f32 1.442695, %v167_v19  ;;  %v275_v27 = vsub.f32 0.0, %v273_v20  ;;  %v707_v29 = vadd.f32 0.5, %v1037_v51  ;;  %v710_v33 = vadd.f32 0.3, %v1035_v48 }
  0xc7   :  { %v222_v30 = vperm.slane %v788_v25, %v1006_v54  ;;  %v171_v31 = vmul.f32 1.442695, %v168_v23  ;;  %v276_v32 = vmul.f32 50.0, %v274_v24  ;;  %v251_v35 = vmul.f32 %v709_v28, %v709_v28 }
  0xc8   :  { %793 = vpow2.f32 %v169_v26  ;;  %v277_v34 = vmul.f32 50.0, %v275_v27  ;;  %v708_v36 = vadd.f32 0.5, %v1035_v48  ;;  %v252_v40 = vmul.f32 %v710_v33, %v710_v33 }
  0xc9   :  { %v790_v37 = vpop.eup %789  ;;  %v223_v38 = vsel %vm179_vm13, %v222_v30, %v221_v22  ;;  %795 = vpow2.f32 %v171_v31  ;;  %v278_v39 = vmul.f32 1.442695, %v276_v32  ;;  %v253_v47 = vsub.f32 0.0, %v251_v35 }
  0xca   :  { %v792_v41 = vpop.eup %791  ;;  %v225_v42 = vsel %vm182_vm14, %v223_v38, 0.0  ;;  %v200_v43 = vperm.slane %v790_v37, %v1006_v54  ;;  %v280_v44 = vmul.f32 1.442695, %v277_v34  ;;  %v254_v50 = vsub.f32 0.0, %v252_v40 }
  0xcb   :  { %v201_v49 = vperm.slane %v792_v41, %v1006_v54  ;;  %797 = vpow2.f32 %v278_v39  ;;  %v230_v45 = vmul.f32 %v707_v29, %v707_v29  ;;  %v255_v53 = vmul.f32 50.0, %v253_v47 }
  0xcc   :  { %226 = vadd.xlane.f32.xlu0 %v225_v42  ;;  %799 = vpow2.f32 %v280_v44  ;;  %v231_v55 = vmul.f32 %v708_v36, %v708_v36  ;;  %v717_v56 = vadd.f32 -0.5, %v1037_v51  ;;  %v256_v46 = vmul.f32 50.0, %v254_v50 }
  0xcd   :  { %v202_v57 = vsel %vm179_vm13, %v201_v49, %v200_v43  ;;  %v232_v58 = vsub.f32 0.0, %v230_v45  ;;  %v718_v59 = vadd.f32 -0.5, %v1035_v48  ;;  %v257_v62 = vmul.f32 1.442695, %v255_v53 }
  0xce   :  { %v794_v60 = vpop.eup %793  ;;  %v204_v61 = vsel %vm182_vm14, %v202_v57, 0.0  ;;  %v233_v63 = vsub.f32 0.0, %v231_v55  ;;  %v335_v0 = vmul.f32 %v717_v56, %v717_v56  ;;  %v259_v4 = vmul.f32 1.442695, %v256_v46 }
  0xcf   :  { %v796_v1 = vpop.eup %795  ;;  %205 = vadd.xlane.f32.xlu2 %v204_v61  ;;  %v177_v3 = vperm.slane %v794_v60, %v1006_v54  ;;  %v234_v5 = vmul.f32 50.0, %v232_v58  ;;  %v336_v6 = vmul.f32 %v718_v59, %v718_v59  ;;  %801 = vpow2.f32 %v257_v62 }
  0xd0   :  { %v178_v7 = vperm.slane %v796_v1, %v1006_v54  ;;  %v235_v8 = vmul.f32 50.0, %v233_v63  ;;  %v337_v9 = vsub.f32 0.0, %v335_v0  ;;  %803 = vpow2.f32 %v259_v4 }
  0xd1   :  { %v798_v10 = vpop.eup %797  ;;  %v236_v11 = vmul.f32 1.442695, %v234_v5  ;;  %v338_v12 = vsub.f32 0.0, %v336_v6  ;;  %v715_v13 = vadd.f32 -0.3, %v1037_v51  ;;  %v723_v40 = vadd.f32 -1.0, %v1004_v52 }
  0xd2   :  { %v800_v2 = vpop.eup %799  ;;  %v180_v14 = vsel %vm179_vm13, %v178_v7, %v177_v3  ;;  %v284_v16 = vperm.slane %v798_v10, %v1006_v54  ;;  %v238_v17 = vmul.f32 1.442695, %v235_v8  ;;  %v339_v18 = vmul.f32 50.0, %v337_v9 }
  0xd3   :  { %v183_v19 = vsel %vm182_vm14, %v180_v14, 0.0  ;;  %v285_v20 = vperm.slane %v800_v2, %v1006_v54  ;;  %805 = vpow2.f32 %v236_v11  ;;  %v340_v21 = vmul.f32 50.0, %v338_v12 }
  0xd4   :  { %184 = vadd.xlane.f32.xlu1 %v183_v19  ;;  %807 = vpow2.f32 %v238_v17  ;;  %v341_v22 = vmul.f32 1.442695, %v339_v18  ;;  %v716_v23 = vadd.f32 -0.3, %v1035_v48  ;;  %v314_v24 = vmul.f32 %v715_v13, %v715_v13 }
  0xd5   :  { %v286_v25 = vsel %vm179_vm13, %v285_v20, %v284_v16  ;;  %v343_v26 = vmul.f32 1.442695, %v340_v21  ;;  %v713_v27 = vadd.f32 -0.1, %v1037_v51  ;;  %v714_v28 = vadd.f32 -0.1, %v1035_v48  ;;  %v802_v29 = vpop.eup %801 }
  0xd6   :  { %v288_v30 = vsel %vm182_vm14, %v286_v25, 0.0  ;;  %809 = vpow2.f32 %v341_v22  ;;  %v315_v31 = vmul.f32 %v716_v23, %v716_v23  ;;  %v316_v32 = vsub.f32 0.0, %v314_v24  ;;  %v804_v33 = vpop.eup %803 }
  0xd7   :  { %289 = vadd.xlane.f32.xlu0 %v288_v30  ;;  %v263_v34 = vperm.slane %v802_v29, %v1006_v54  ;;  %811 = vpow2.f32 %v343_v26  ;;  %v293_v35 = vmul.f32 %v713_v27, %v713_v27  ;;  %v294_v36 = vmul.f32 %v714_v28, %v714_v28 }
  0xd8   :  { %v264_v37 = vperm.slane %v804_v33, %v1006_v54  ;;  %v317_v38 = vsub.f32 0.0, %v315_v31  ;;  %v318_v39 = vmul.f32 50.0, %v316_v32  ;;  %v724_v44 = vadd.f32 -1.0, %v1022_v15 }
  0xd9   :  { %v806_v41 = vpop.eup %805  ;;  %v295_v42 = vsub.f32 0.0, %v293_v35  ;;  %v296_v43 = vsub.f32 0.0, %v294_v36  ;;  %v721_v47 = vadd.f32 -0.9, %v1037_v51  ;;  %v398_v61 = vmul.f32 %v723_v40, %v723_v40 }
  0xda   :  { %v808_v49 = vpop.eup %807  ;;  %v265_v50 = vsel %vm179_vm13, %v264_v37, %v263_v34  ;;  %v242_v45 = vperm.slane %v806_v41, %v1006_v54  ;;  %v319_v53 = vmul.f32 50.0, %v317_v38  ;;  %v320_v55 = vmul.f32 1.442695, %v318_v39 }
  0xdb   :  { %v267_v56 = vsel %vm182_vm14, %v265_v50, 0.0  ;;  %v243_v57 = vperm.slane %v808_v49, %v1006_v54  ;;  %v297_v46 = vmul.f32 50.0, %v295_v42  ;;  %v298_v58 = vmul.f32 50.0, %v296_v43 }
  0xdc   :  { %v810_v59 = vpop.eup %809  ;;  %268 = vadd.xlane.f32.xlu2 %v267_v56  ;;  %813 = vpow2.f32 %v320_v55  ;;  %v322_v60 = vmul.f32 1.442695, %v319_v53  ;;  %v399_v62 = vmul.f32 %v724_v44, %v724_v44  ;;  %v400_v7 = vsub.f32 0.0, %v398_v61 }
  0xdd   :  { %v812_v63 = vpop.eup %811  ;;  %v244_v0 = vsel %vm179_vm13, %v243_v57, %v242_v45  ;;  %v347_v1 = vperm.slane %v810_v59, %v1006_v54  ;;  %v299_v3 = vmul.f32 1.442695, %v297_v46  ;;  %v301_v4 = vmul.f32 1.442695, %v298_v58 }
  0xde   :  { %v246_v5 = vsel %vm182_vm14, %v244_v0, 0.0  ;;  %v348_v6 = vperm.slane %v812_v63, %v1006_v54  ;;  %815 = vpow2.f32 %v322_v60  ;;  %v401_v8 = vsub.f32 0.0, %v399_v62 }
  0xdf   :  { %247 = vadd.xlane.f32.xlu1 %v246_v5  ;;  %817 = vpow2.f32 %v299_v3  ;;  %v722_v9 = vadd.f32 -0.9, %v1035_v48  ;;  %v377_v10 = vmul.f32 %v721_v47, %v721_v47  ;;  %v402_v12 = vmul.f32 500000.0, %v400_v7 }
  0xe0   :  { %v349_v11 = vsel %vm179_vm13, %v348_v6, %v347_v1  ;;  %819 = vpow2.f32 %v301_v4  ;;  %v719_v13 = vadd.f32 -0.7, %v1037_v51  ;;  %v403_v14 = vmul.f32 500000.0, %v401_v8 }
  0xe1   :  { %v351_v2 = vsel %vm182_vm14, %v349_v11, 0.0  ;;  %v378_v16 = vmul.f32 %v722_v9, %v722_v9  ;;  %v379_v17 = vsub.f32 0.0, %v377_v10  ;;  %v404_v19 = vmul.f32 1.442695, %v402_v12 }
  0xe2   :  { %v814_v18 = vpop.eup %813  ;;  %352 = vadd.xlane.f32.xlu0 %v351_v2  ;;  %v720_v20 = vadd.f32 -0.7, %v1035_v48  ;;  %v356_v21 = vmul.f32 %v719_v13, %v719_v13  ;;  %v729_v22 = vadd.f32 0.5, %v1004_v52  ;;  %v406_v24 = vmul.f32 1.442695, %v403_v14 }
  0xe3   :  { %v326_v23 = vperm.slane %v814_v18, %v1006_v54  ;;  %v380_v25 = vsub.f32 0.0, %v378_v16  ;;  %v381_v26 = vmul.f32 50.0, %v379_v17  ;;  %821 = vpow2.f32 %v404_v19 }
  0xe4   :  { %v816_v27 = vpop.eup %815  ;;  %v357_v51 = vmul.f32 %v720_v20, %v720_v20  ;;  %v358_v28 = vsub.f32 0.0, %v356_v21  ;;  %v730_v29 = vadd.f32 0.5, %v1022_v15  ;;  %823 = vpow2.f32 %v406_v24 }
  0xe5   :  { %v818_v30 = vpop.eup %817  ;;  %v327_v31 = vperm.slane %v816_v27, %v1006_v54  ;;  %v382_v32 = vmul.f32 50.0, %v380_v25  ;;  %v383_v48 = vmul.f32 1.442695, %v381_v26  ;;  %v461_v37 = vmul.f32 %v729_v22, %v729_v22 }
  0xe6   :  { %v820_v33 = vpop.eup %819  ;;  %v305_v34 = vperm.slane %v818_v30, %v1006_v54  ;;  %v359_v35 = vsub.f32 0.0, %v357_v51  ;;  %v360_v36 = vmul.f32 50.0, %v358_v28  ;;  %v462_v44 = vmul.f32 %v730_v29, %v730_v29 }
  0xe7   :  { %v328_v38 = vsel %vm179_vm13, %v327_v31, %v326_v23  ;;  %v306_v39 = vperm.slane %v820_v33, %v1006_v54  ;;  %825 = vpow2.f32 %v383_v48  ;;  %v385_v40 = vmul.f32 1.442695, %v382_v32 }
  0xe8   :  { %v330_v41 = vsel %vm182_vm14, %v328_v38, 0.0  ;;  %v361_v42 = vmul.f32 50.0, %v359_v35  ;;  %v362_v43 = vmul.f32 1.442695, %v360_v36  ;;  %v463_v49 = vsub.f32 0.0, %v461_v37 }
  0xe9   :  { %331 = vadd.xlane.f32.xlu2 %v330_v41  ;;  %v307_v47 = vsel %vm179_vm13, %v306_v39, %v305_v34  ;;  %827 = vpow2.f32 %v385_v40  ;;  %v727_v50 = vadd.f32 0.7, %v1004_v52  ;;  %v822_v45 = vpop.eup %821  ;;  %v464_v56 = vsub.f32 0.0, %v462_v44 }
  0xea   :  { %v309_v53 = vsel %vm182_vm14, %v307_v47, 0.0  ;;  %829 = vpow2.f32 %v362_v43  ;;  %v364_v55 = vmul.f32 1.442695, %v361_v42  ;;  %v824_v57 = vpop.eup %823  ;;  %v410_v46 = vperm.slane %v822_v45, %v1006_v54 }
  0xeb   :  { %310 = vadd.xlane.f32.xlu1 %v309_v53  ;;  %v465_v58 = vmul.f32 50.0, %v463_v49  ;;  %v728_v59 = vadd.f32 0.7, %v1022_v15  ;;  %v440_v60 = vmul.f32 %v727_v50, %v727_v50  ;;  %v411_v61 = vperm.slane %v824_v57, %v1006_v54 }
  0xec   :  { %831 = vpow2.f32 %v364_v55  ;;  %v466_v62 = vmul.f32 50.0, %v464_v56  ;;  %v725_v63 = vadd.f32 0.9, %v1004_v52  ;;  %v726_v5 = vadd.f32 0.9, %v1022_v15 }
  0xed   :  { %v826_v0 = vpop.eup %825  ;;  %v467_v1 = vmul.f32 1.442695, %v465_v58  ;;  %v441_v3 = vmul.f32 %v728_v59, %v728_v59  ;;  %v442_v4 = vsub.f32 0.0, %v440_v60  ;;  %v412_v6 = vsel %vm179_vm13, %v411_v61, %v410_v46 }
  0xee   :  { %v389_v7 = vperm.slane %v826_v0, %v1006_v54  ;;  %v469_v8 = vmul.f32 1.442695, %v466_v62  ;;  %v419_v9 = vmul.f32 %v725_v63, %v725_v63  ;;  %v414_v11 = vsel %vm182_vm14, %v412_v6, 0.0 }
  0xef   :  { %v828_v10 = vpop.eup %827  ;;  %833 = vpow2.f32 %v467_v1  ;;  %v443_v12 = vsub.f32 0.0, %v441_v3  ;;  %v444_v13 = vmul.f32 50.0, %v442_v4  ;;  %415 = vadd.xlane.f32.xlu0 %v414_v11  ;;  %v420_v16 = vmul.f32 %v726_v5, %v726_v5 }
  0xf0   :  { %v830_v2 = vpop.eup %829  ;;  %v390_v14 = vperm.slane %v828_v10, %v1006_v54  ;;  %835 = vpow2.f32 %v469_v8  ;;  %v421_v17 = vsub.f32 0.0, %v419_v9  ;;  %v731_v21 = vadd.f32 0.3, %v1004_v52 }
  0xf1   :  { %v368_v18 = vperm.slane %v830_v2, %v1006_v54  ;;  %v445_v19 = vmul.f32 50.0, %v443_v12  ;;  %v446_v20 = vmul.f32 1.442695, %v444_v13  ;;  %v422_v24 = vsub.f32 0.0, %v420_v16 }
  0xf2   :  { %v832_v22 = vpop.eup %831  ;;  %v391_v23 = vsel %vm179_vm13, %v390_v14, %v389_v7  ;;  %v423_v25 = vmul.f32 50.0, %v421_v17  ;;  %v732_v26 = vadd.f32 0.3, %v1022_v15  ;;  %v482_v31 = vmul.f32 %v731_v21, %v731_v21 }
  0xf3   :  { %v393_v27 = vsel %vm182_vm14, %v391_v23, 0.0  ;;  %v369_v51 = vperm.slane %v832_v22, %v1006_v54  ;;  %837 = vpow2.f32 %v446_v20  ;;  %v448_v28 = vmul.f32 1.442695, %v445_v19 }
  0xf4   :  { %394 = vadd.xlane.f32.xlu2 %v393_v27  ;;  %v424_v29 = vmul.f32 50.0, %v422_v24  ;;  %v425_v30 = vmul.f32 1.442695, %v423_v25  ;;  %v483_v32 = vmul.f32 %v732_v26, %v732_v26  ;;  %v484_v37 = vsub.f32 0.0, %v482_v31 }
  0xf5   :  { %v834_v48 = vpop.eup %833  ;;  %v370_v52 = vsel %vm179_vm13, %v369_v51, %v368_v18  ;;  %839 = vpow2.f32 %v448_v28  ;;  %v957_v25 = vmov 0.0   ;;  %vm639_vm6 = vcmask 56320  }
  0xf6   :  { %v836_v33 = vpop.eup %835  ;;  %v372_v34 = vsel %vm182_vm14, %v370_v52, 0.0  ;;  %841 = vpow2.f32 %v425_v30  ;;  %v427_v15 = vmul.f32 1.442695, %v424_v29  ;;  %v473_v35 = vperm.slane %v834_v48, %v1006_v54  ;;  %673 = vst.msk [vmem:[#allocation2] sm:$0x3] %vm672_vm4, %v957_v25 }
  0xf7   :  { %373 = vadd.xlane.f32.xlu1 %v372_v34  ;;  %v474_v36 = vperm.slane %v836_v33, %v1006_v54  ;;  %v485_v38 = vsub.f32 0.0, %v483_v32  ;;  %v486_v41 = vmul.f32 50.0, %v484_v37  ;;  %vm641_vm7 = vcmask 64512  }
  0xf8   :  { %843 = vpow2.f32 %v427_v15  ;;  %vm643_vm8 = vcmask 72704   ;;  %vm645_vm9 = vcmask 80896   ;;  %vm647_vm10 = vcmask 89088  }
  0xf9   :  { %v838_v39 = vpop.eup %837  ;;  %v475_v40 = vsel %vm179_vm13, %v474_v36, %v473_v35  ;;  %v487_v42 = vmul.f32 50.0, %v485_v38  ;;  %v488_v47 = vmul.f32 1.442695, %v486_v41  ;;  %vm649_vm11 = vcmask 97280  }
  0xfa   :  { %v477_v43 = vsel %vm182_vm14, %v475_v40, 0.0  ;;  %v452_v45 = vperm.slane %v838_v39, %v1006_v54  ;;  %vm651_vm12 = vcmask 105472  }
  0xfb   :  { %v840_v44 = vpop.eup %839  ;;  %478 = vadd.xlane.f32.xlu0 %v477_v43  ;;  %v490_v49 = vmul.f32 1.442695, %v487_v42  ;;  %845 = vpow2.f32 %v488_v47 }
  0xfc   :  { %v842_v50 = vpop.eup %841  ;;  %v453_v53 = vperm.slane %v840_v44, %v1006_v54 }
  0xfd   :  { %847 = vpow2.f32 %v490_v49  ;;  %v431_v46 = vperm.slane %v842_v50, %v1006_v54  ;;  %v674_v41 = vld [vmem:[#allocation2] sm:$0x3] }
  0xfe   :  { %v844_v55 = vpop.eup %843  ;;  %v454_v56 = vsel %vm179_vm13, %v453_v53, %v452_v45 }
  0xff   :  { %v456_v57 = vsel %vm182_vm14, %v454_v56, 0.0  ;;  %v432_v58 = vperm.slane %v844_v55, %v1006_v54 }
 0x100   :  { %457 = vadd.xlane.f32.xlu2 %v456_v57 }
 0x101   :  { %v433_v59 = vsel %vm179_vm13, %v432_v58, %v431_v46  ;;  %v846_v61 = vpop.eup %845 }
 0x102   :  { %v435_v60 = vsel %vm182_vm14, %v433_v59, 0.0  ;;  %v494_v63 = vperm.slane %v846_v61, %v1006_v54 }
 0x103   :  { %436 = vadd.xlane.f32.xlu1 %v435_v60  ;;  %v848_v62 = vpop.eup %847 }
 0x104   :  { %v495_v0 = vperm.slane %v848_v62, %v1006_v54 }
 0x106   :  { %v496_v1 = vsel %vm179_vm13, %v495_v0, %v494_v63  ;;  %vm653_vm13 = vcmask 113664  }
 0x107   :  { %v498_v3 = vsel %vm182_vm14, %v496_v1, 0.0  ;;  %vm655_vm14 = vcmask 121856  }
 0x10b   :  { %499 = vadd.xlane.f32.xlu1 %v498_v3 }
 0x12f   :  { %v563_v6 = vpop.xlane.xlu0 %562 }
 0x130   :  { %v542_v4 = vpop.xlane.xlu2 %541 }
 0x131   :  { %v521_v5 = vpop.xlane.xlu1 %520 }
 0x132   :  { %v657_v7 = vsel %vm627_vm15, %v521_v5, %v542_v4 }
 0x133   :  { %v658_v9 = vsel %vm629_vm0, %v657_v7, %v563_v6 }
 0x137   :  { %v626_v11 = vpop.xlane.xlu0 %625 }
 0x138   :  { %v605_v8 = vpop.xlane.xlu2 %604 }
 0x139   :  { %v584_v10 = vpop.xlane.xlu1 %583 }
 0x13a   :  { %v659_v54 = vsel %vm631_vm1, %v658_v9, %v584_v10 }
 0x13b   :  { %v660_v12 = vsel %vm633_vm2, %v659_v54, %v605_v8 }
 0x13c   :  { %v661_v13 = vsel %vm635_vm3, %v660_v12, %v626_v11 }
 0x13d   :  { %663 = vrot.lane.b32.xlu2 %v661_v13, %s956_s0 }
 0x13f   :  { %v227_v14 = vpop.xlane.xlu0 %226 }
 0x142   :  { %v206_v2 = vpop.xlane.xlu2 %205 }
 0x147   :  { %v185_v16 = vpop.xlane.xlu1 %184 }
 0x148   :  { %v628_v17 = vsel %vm627_vm15, %v185_v16, %v206_v2  ;;  %vm666_vm15 = vcmask 130048  }
 0x149   :  { %v630_v18 = vsel %vm629_vm0, %v628_v17, %v227_v14 }
 0x14a   :  { %v290_v23 = vpop.xlane.xlu0 %289 }
 0x14f   :  { %v269_v19 = vpop.xlane.xlu2 %268 }
 0x152   :  { %v248_v20 = vpop.xlane.xlu1 %247 }
 0x153   :  { %v632_v21 = vsel %vm631_vm1, %v630_v18, %v248_v20 }
 0x154   :  { %v634_v22 = vsel %vm633_vm2, %v632_v21, %v269_v19 }
 0x155   :  { %v636_v24 = vsel %vm635_vm3, %v634_v22, %v290_v23  ;;  %v353_v28 = vpop.xlane.xlu0 %352 }
 0x15c   :  { %v332_v27 = vpop.xlane.xlu2 %331 }
 0x15e   :  { %v311_v26 = vpop.xlane.xlu1 %310 }
 0x15f   :  { %v638_v29 = vsel %vm637_vm5, %v636_v24, %v311_v26 }
 0x160   :  { %v640_v30 = vsel %vm639_vm6, %v638_v29, %v332_v27 }
 0x161   :  { %v642_v32 = vsel %vm641_vm7, %v640_v30, %v353_v28 }
 0x162   :  { %v416_v33 = vpop.xlane.xlu0 %415 }
 0x167   :  { %v395_v31 = vpop.xlane.xlu2 %394 }
 0x16a   :  { %v374_v51 = vpop.xlane.xlu1 %373 }
 0x16b   :  { %v644_v48 = vsel %vm643_vm8, %v642_v32, %v374_v51 }
 0x16c   :  { %v646_v34 = vsel %vm645_vm9, %v644_v48, %v395_v31 }
 0x16d   :  { %v648_v15 = vsel %vm647_vm10, %v646_v34, %v416_v33 }
 0x16e   :  { %v479_v39 = vpop.xlane.xlu0 %478 }
 0x173   :  { %v458_v35 = vpop.xlane.xlu2 %457 }
 0x176   :  { %v437_v52 = vpop.xlane.xlu1 %436 }
 0x177   :  { %v650_v36 = vsel %vm649_vm11, %v648_v15, %v437_v52 }
 0x178   :  { %v652_v37 = vsel %vm651_vm12, %v650_v36, %v458_v35 }
 0x179   :  { %v654_v40 = vsel %vm653_vm13, %v652_v37, %v479_v39 }
 0x17e   :  { %v500_v38 = vpop.xlane.xlu1 %499 }
 0x17f   :  { %v656_v42 = vsel %vm655_vm14, %v654_v40, %v500_v38 }
 0x197   :  { %v664_v43 = vpop.permute.xlu2 %663 }
 0x198   :  { %v667_v44 = vsel %vm666_vm15, %v656_v42, %v664_v43 }
 0x199   :  { %v675_v47 = vadd.f32 %v674_v41, %v667_v44 }
 0x19b   :  { %677 = vst.msk [vmem:[#allocation2] sm:$0x3] %vm672_vm4, %v675_v47 }
 0x1a2   :  { %v681_v49 = vld [vmem:[#allocation2] sm:$0x3] }
 0x1a3   :  { %682 = vst.msk [vmem:[#allocation9] sm:$0x3] %vm672_vm4, %v681_v49 }
 0x1a4   :  { %693 = dma.vmem_to_hbm [thread:$0]  %s689_s28, 32, %s691_s4, [#allocation5]  }
 0x1a5   :  { %949 = dma.done.wait [#allocation5], 32  }
 0x1a6   :  { %950 = vsyncadd [#allocation5], 4294967264 }
 0x1a7   :  { %698 = vsyncpa [#allocation4], 1 }
 0x1a8   :  { %699 = vsyncpa [#allocation7], 1 }
 0x1a9   :  { %700 = vsyncpa [#allocation5], 1 }

</bundles_post_ra>
